<compile_context>
chip_gen: v7x
topology: tpu7x:2x2x1
jax: 0.10.0
libtpu: 0.0.40
codegen_flags: <defaults>
</compile_context>

<pallas_src>
import jax
import jax.numpy as jnp
from jax.experimental import pallas as pl
from jax.experimental.pallas import tpu as pltpu

NEG_SLOPE = 0.01          # torch.nn.LeakyReLU default negative_slope
HIDDEN = 256
LANE = 128
SUBLANE_BF16 = 16         # bf16 packs 16 rows per vreg sublane group


def _round_up(x, m):
    return (x + m - 1) // m * m


def _leaky_relu(v):
    # max(v, slope*v) == LeakyReLU for 0 < slope < 1; one VALU op.
    return jnp.maximum(v, NEG_SLOPE * v)


def generator_kernel(x_ref,
                     w1_ref, b1_ref,
                     w2_ref, b2_ref,
                     w3_ref, b3_ref,
                     w4_ref, b4_ref,
                     o_ref):
    # One batch tile per grid step; weights have constant block indices so
    # they stay VMEM-resident across steps.
    x = x_ref[...]                                            # bf16 (TB, in_pad)

    # fc1..fc3: bf16 operands, f32 MXU accumulation, bf16 elementwise epilogue.
    h = jnp.dot(x, w1_ref[...], preferred_element_type=jnp.float32)
    h = _leaky_relu(h.astype(jnp.bfloat16) + b1_ref[...])

    h = jnp.dot(h, w2_ref[...], preferred_element_type=jnp.float32)
    h = _leaky_relu(h.astype(jnp.bfloat16) + b2_ref[...])

    h = jnp.dot(h, w3_ref[...], preferred_element_type=jnp.float32)
    h = _leaky_relu(h.astype(jnp.bfloat16) + b3_ref[...])

    out = jnp.dot(h, w4_ref[...], preferred_element_type=jnp.float32)
    out = out + b4_ref[...]                                   # promotes to f32
    o_ref[...] = out.astype(o_ref.dtype)                      # lane-dense store


def prepare_params(params):
    """One-time prep: pad feature dims, cast to bf16 (hoisted out of forward)."""
    in_dim = params["w1"].shape[0]
    dim_out = params["w4"].shape[1]
    in_pad = _round_up(in_dim, SUBLANE_BF16)                  # fc1 K, sublane aligned
    out_pad = _round_up(dim_out, LANE)                        # fc4 N, lane dense

    bf = jnp.bfloat16
    w1 = jnp.zeros((in_pad, HIDDEN), bf).at[:in_dim, :].set(params["w1"].astype(bf))
    w4 = jnp.zeros((HIDDEN, out_pad), bf).at[:, :dim_out].set(params["w4"].astype(bf))
    b4 = jnp.zeros((1, out_pad), bf).at[:, :dim_out].set(params["b4"].astype(bf))

    return dict(
        w1=w1, b1=params["b1"].astype(bf),
        w2=params["w2"].astype(bf), b2=params["b2"].astype(bf),
        w3=params["w3"].astype(bf), b3=params["b3"].astype(bf),
        w4=w4, b4=b4,
        in_dim=in_dim, dim_out=dim_out, in_pad=in_pad, out_pad=out_pad,
    )


def generator_forward(x, prepped, *, tile_b=2048, min_tiles=2):
    """x: (batch, 2*D+1) float32; prepped: output of prepare_params."""
    batch, in_dim = x.shape
    assert in_dim == prepped["in_dim"]
    in_pad, out_pad = prepped["in_pad"], prepped["out_pad"]
    dim_out = prepped["dim_out"]

    # Adaptive batch tiling: minimize padding waste and (when batch allows)
    # keep >= min_tiles grid steps so both v7x TensorCores get work.
    n_tiles = max(1, -(-batch // tile_b))
    if batch >= min_tiles * SUBLANE_BF16:
        n_tiles = max(n_tiles, min_tiles)
    tb = _round_up(-(-batch // n_tiles), SUBLANE_BF16)
    batch_pad = _round_up(batch, tb)
    grid = (batch_pad // tb,)

    # Per-call input padding/cast (zeros in padded rows/cols => identical math).
    x_p = jnp.zeros((batch_pad, in_pad), jnp.bfloat16).at[:batch, :in_dim].set(
        x.astype(jnp.bfloat16))

    def tiled(shape):
        return pl.BlockSpec(shape, lambda i: (i, 0))          # streamed per tile

    def resident(shape):
        return pl.BlockSpec(shape, lambda i: (0, 0))          # constant block index

    flops = 2 * batch_pad * (in_pad * HIDDEN + 2 * HIDDEN * HIDDEN + HIDDEN * out_pad)
    weight_bytes = 2 * (in_pad * HIDDEN + 2 * HIDDEN * HIDDEN + HIDDEN * out_pad
                        + 3 * HIDDEN + out_pad)
    bytes_accessed = x_p.size * 2 + batch_pad * out_pad * 4 + weight_bytes

    out = pl.pallas_call(
        generator_kernel,
        out_shape=jax.ShapeDtypeStruct((batch_pad, out_pad), jnp.float32),
        grid=grid,
        in_specs=[
            tiled((tb, in_pad)),
            resident((in_pad, HIDDEN)), resident((1, HIDDEN)),
            resident((HIDDEN, HIDDEN)), resident((1, HIDDEN)),
            resident((HIDDEN, HIDDEN)), resident((1, HIDDEN)),
            resident((HIDDEN, out_pad)), resident((1, out_pad)),
        ],
        out_specs=tiled((tb, out_pad)),
        compiler_params=pltpu.CompilerParams(
            dimension_semantics=("parallel",)),
        cost_estimate=pl.CostEstimate(
            flops=flops, transcendentals=0, bytes_accessed=bytes_accessed),
    )(x_p,
      prepped["w1"], prepped["b1"],
      prepped["w2"], prepped["b2"],
      prepped["w3"], prepped["b3"],
      prepped["w4"], prepped["b4"])

    return out[:batch, :dim_out]


def init_params(key, dimension):
    """Deterministic synthetic parameters matching nn.Linear shapes
    (stored transposed: (in, out)); biases kept 2-D (1, out)."""
    in_dim = 2 * dimension + 1
    sizes = [(in_dim, HIDDEN), (HIDDEN, HIDDEN), (HIDDEN, HIDDEN), (HIDDEN, dimension)]
    params = {}
    for i, (fan_in, fan_out) in enumerate(sizes, start=1):
        key, kw, kb = jax.random.split(key, 3)
        bound = 1.0 / jnp.sqrt(fan_in)  # same scale as PyTorch default init
        params[f"w{i}"] = jax.random.uniform(
            kw, (fan_in, fan_out), jnp.float32, minval=-bound, maxval=bound)
        params[f"b{i}"] = jax.random.uniform(
            kb, (1, fan_out), jnp.float32, minval=-bound, maxval=bound)
    return params


def reference_forward(x, params):
    h = x
    for i in (1, 2, 3):
        h = _leaky_relu(h @ params[f"w{i}"] + params[f"b{i}"])
    return h @ params["w4"] + params["b4"]


if __name__ == "__main__":
    DIMENSION = 4
    BATCH = 8

    key = jax.random.PRNGKey(0)
    key, kx = jax.random.split(key)
    params = init_params(key, DIMENSION)
    prepped = prepare_params(params)                 # one-time pad/cast (hoisted)
    x = jax.random.normal(kx, (BATCH, 2 * DIMENSION + 1), jnp.float32)

    out = jax.block_until_ready(generator_forward(x, prepped))
    ref = reference_forward(x, params)
    assert out.shape == (BATCH, DIMENSION)
    # bf16 matmul data path vs f32 reference -> loose-but-meaningful tolerance.
    assert jnp.allclose(out, ref, atol=5e-2, rtol=5e-2)

    # Exercise the multi-tile grid path (grid > 1, padded batch tail).
    key, kx2 = jax.random.split(key)
    x_big = jax.random.normal(kx2, (600, 2 * DIMENSION + 1), jnp.float32)
    out_big = jax.block_until_ready(generator_forward(x_big, prepped, tile_b=256))
    ref_big = reference_forward(x_big, params)
    assert out_big.shape == (600, DIMENSION)
    assert jnp.allclose(out_big, ref_big, atol=5e-2, rtol=5e-2)

    print("KERNEL_OK")
</pallas_src>

<mosaic_0001>
module attributes {stable_mosaic.version = 11 : i64} {
  func.func @generator_kernel(%arg0: i32, %arg1: memref<16x16xbf16, #tpu.memory_space<vmem>>, %arg2: memref<16x256xbf16, #tpu.memory_space<vmem>>, %arg3: memref<1x256xbf16, #tpu.memory_space<vmem>>, %arg4: memref<256x256xbf16, #tpu.memory_space<vmem>>, %arg5: memref<1x256xbf16, #tpu.memory_space<vmem>>, %arg6: memref<256x256xbf16, #tpu.memory_space<vmem>>, %arg7: memref<1x256xbf16, #tpu.memory_space<vmem>>, %arg8: memref<256x128xbf16, #tpu.memory_space<vmem>>, %arg9: memref<1x128xbf16, #tpu.memory_space<vmem>>, %arg10: memref<16x128xf32, #tpu.memory_space<vmem>>) attributes {dimension_semantics = [#tpu.dimension_semantics<parallel>], iteration_bounds = array<i64: 1>, scalar_prefetch = 0 : i64, scratch_operands = 0 : i64, tpu.core_type = #tpu.core_type<tc>, window_params = [{transform_indices = @transform_0, window_bounds = array<i64: 16, 16>}, {pipeline_mode = #tpu.pipeline_mode<synchronous>, transform_indices = @transform_1, window_bounds = array<i64: 16, 256>}, {pipeline_mode = #tpu.pipeline_mode<synchronous>, transform_indices = @transform_2, window_bounds = array<i64: 1, 256>}, {pipeline_mode = #tpu.pipeline_mode<synchronous>, transform_indices = @transform_3, window_bounds = array<i64: 256, 256>}, {pipeline_mode = #tpu.pipeline_mode<synchronous>, transform_indices = @transform_4, window_bounds = array<i64: 1, 256>}, {pipeline_mode = #tpu.pipeline_mode<synchronous>, transform_indices = @transform_5, window_bounds = array<i64: 256, 256>}, {pipeline_mode = #tpu.pipeline_mode<synchronous>, transform_indices = @transform_6, window_bounds = array<i64: 1, 256>}, {pipeline_mode = #tpu.pipeline_mode<synchronous>, transform_indices = @transform_7, window_bounds = array<i64: 256, 128>}, {pipeline_mode = #tpu.pipeline_mode<synchronous>, transform_indices = @transform_8, window_bounds = array<i64: 1, 128>}, {transform_indices = @transform_9, window_bounds = array<i64: 16, 128>}]} {
    %c0 = arith.constant 0 : index
    %c0_0 = arith.constant 0 : index
    %0 = vector.load %arg1[%c0, %c0_0] : memref<16x16xbf16, #tpu.memory_space<vmem>>, vector<16x16xbf16>
    %c0_1 = arith.constant 0 : index
    %c0_2 = arith.constant 0 : index
    %1 = vector.load %arg2[%c0_1, %c0_2] : memref<16x256xbf16, #tpu.memory_space<vmem>>, vector<16x256xbf16>
    %cst = arith.constant dense<0.000000e+00> : vector<16x256xf32>
    %2 = tpu.matmul %0, %1, %cst {dimension_numbers = #tpu.dot_dimension_numbers<[1], [0], [0], [1], [0, 0, 1, 1], [], []>} : vector<16x16xbf16>, vector<16x256xbf16>, vector<16x256xf32> -> vector<16x256xf32>
    %3 = arith.truncf %2 : vector<16x256xf32> to vector<16x256xbf16>
    %c0_3 = arith.constant 0 : index
    %c0_4 = arith.constant 0 : index
    %4 = vector.load %arg3[%c0_3, %c0_4] : memref<1x256xbf16, #tpu.memory_space<vmem>>, vector<1x256xbf16>
    %5 = vector.broadcast %4 : vector<1x256xbf16> to vector<16x256xbf16>
    %6 = arith.addf %3, %5 : vector<16x256xbf16>
    %cst_5 = arith.constant 1.000980e-02 : bf16
    %7 = vector.broadcast %cst_5 : bf16 to vector<16x256xbf16>
    %8 = arith.mulf %7, %6 : vector<16x256xbf16>
    %9 = arith.maximumf %6, %8 : vector<16x256xbf16>
    %c0_6 = arith.constant 0 : index
    %c0_7 = arith.constant 0 : index
    %10 = vector.load %arg4[%c0_6, %c0_7] : memref<256x256xbf16, #tpu.memory_space<vmem>>, vector<256x256xbf16>
    %cst_8 = arith.constant dense<0.000000e+00> : vector<16x256xf32>
    %11 = tpu.matmul %9, %10, %cst_8 {dimension_numbers = #tpu.dot_dimension_numbers<[1], [0], [0], [1], [0, 0, 1, 1], [], []>} : vector<16x256xbf16>, vector<256x256xbf16>, vector<16x256xf32> -> vector<16x256xf32>
    %12 = arith.truncf %11 : vector<16x256xf32> to vector<16x256xbf16>
    %c0_9 = arith.constant 0 : index
    %c0_10 = arith.constant 0 : index
    %13 = vector.load %arg5[%c0_9, %c0_10] : memref<1x256xbf16, #tpu.memory_space<vmem>>, vector<1x256xbf16>
    %14 = vector.broadcast %13 : vector<1x256xbf16> to vector<16x256xbf16>
    %15 = arith.addf %12, %14 : vector<16x256xbf16>
    %cst_11 = arith.constant 1.000980e-02 : bf16
    %16 = vector.broadcast %cst_11 : bf16 to vector<16x256xbf16>
    %17 = arith.mulf %16, %15 : vector<16x256xbf16>
    %18 = arith.maximumf %15, %17 : vector<16x256xbf16>
    %c0_12 = arith.constant 0 : index
    %c0_13 = arith.constant 0 : index
    %19 = vector.load %arg6[%c0_12, %c0_13] : memref<256x256xbf16, #tpu.memory_space<vmem>>, vector<256x256xbf16>
    %cst_14 = arith.constant dense<0.000000e+00> : vector<16x256xf32>
    %20 = tpu.matmul %18, %19, %cst_14 {dimension_numbers = #tpu.dot_dimension_numbers<[1], [0], [0], [1], [0, 0, 1, 1], [], []>} : vector<16x256xbf16>, vector<256x256xbf16>, vector<16x256xf32> -> vector<16x256xf32>
    %21 = arith.truncf %20 : vector<16x256xf32> to vector<16x256xbf16>
    %c0_15 = arith.constant 0 : index
    %c0_16 = arith.constant 0 : index
    %22 = vector.load %arg7[%c0_15, %c0_16] : memref<1x256xbf16, #tpu.memory_space<vmem>>, vector<1x256xbf16>
    %23 = vector.broadcast %22 : vector<1x256xbf16> to vector<16x256xbf16>
    %24 = arith.addf %21, %23 : vector<16x256xbf16>
    %cst_17 = arith.constant 1.000980e-02 : bf16
    %25 = vector.broadcast %cst_17 : bf16 to vector<16x256xbf16>
    %26 = arith.mulf %25, %24 : vector<16x256xbf16>
    %27 = arith.maximumf %24, %26 : vector<16x256xbf16>
    %c0_18 = arith.constant 0 : index
    %c0_19 = arith.constant 0 : index
    %28 = vector.load %arg8[%c0_18, %c0_19] : memref<256x128xbf16, #tpu.memory_space<vmem>>, vector<256x128xbf16>
    %cst_20 = arith.constant dense<0.000000e+00> : vector<16x128xf32>
    %29 = tpu.matmul %27, %28, %cst_20 {dimension_numbers = #tpu.dot_dimension_numbers<[1], [0], [0], [1], [0, 0, 1, 1], [], []>} : vector<16x256xbf16>, vector<256x128xbf16>, vector<16x128xf32> -> vector<16x128xf32>
    %c0_21 = arith.constant 0 : index
    %c0_22 = arith.constant 0 : index
    %30 = vector.load %arg9[%c0_21, %c0_22] : memref<1x128xbf16, #tpu.memory_space<vmem>>, vector<1x128xbf16>
    %31 = arith.extf %30 : vector<1x128xbf16> to vector<1x128xf32>
    %32 = vector.broadcast %31 : vector<1x128xf32> to vector<16x128xf32>
    %33 = arith.addf %29, %32 : vector<16x128xf32>
    %c0_23 = arith.constant 0 : index
    %c0_24 = arith.constant 0 : index
    %34 = vector.load %arg10[%c0_23, %c0_24] : memref<16x128xf32, #tpu.memory_space<vmem>>, vector<16x128xf32>
    tpu.vector_store %arg10[%c0_23, %c0_24], %33 {strides = array<i32>} : memref<16x128xf32, #tpu.memory_space<vmem>>, vector<16x128xf32>,
    return
  }
  func.func @transform_0(%arg0: i32) -> (i32, i32) {
    %c0_i32 = arith.constant 0 : i32
    %c0_i32_0 = arith.constant 0 : i32
    return %arg0, %c0_i32 : i32, i32
  }
  func.func @transform_1(%arg0: i32) -> (i32, i32) {
    %c0_i32 = arith.constant 0 : i32
    %c0_i32_0 = arith.constant 0 : i32
    %c0_i32_1 = arith.constant 0 : i32
    return %c0_i32, %c0_i32_0 : i32, i32
  }
  func.func @transform_2(%arg0: i32) -> (i32, i32) {
    %c0_i32 = arith.constant 0 : i32
    %c0_i32_0 = arith.constant 0 : i32
    %c0_i32_1 = arith.constant 0 : i32
    return %c0_i32, %c0_i32_0 : i32, i32
  }
  func.func @transform_3(%arg0: i32) -> (i32, i32) {
    %c0_i32 = arith.constant 0 : i32
    %c0_i32_0 = arith.constant 0 : i32
    %c0_i32_1 = arith.constant 0 : i32
    return %c0_i32, %c0_i32_0 : i32, i32
  }
  func.func @transform_4(%arg0: i32) -> (i32, i32) {
    %c0_i32 = arith.constant 0 : i32
    %c0_i32_0 = arith.constant 0 : i32
    %c0_i32_1 = arith.constant 0 : i32
    return %c0_i32, %c0_i32_0 : i32, i32
  }
  func.func @transform_5(%arg0: i32) -> (i32, i32) {
    %c0_i32 = arith.constant 0 : i32
    %c0_i32_0 = arith.constant 0 : i32
    %c0_i32_1 = arith.constant 0 : i32
    return %c0_i32, %c0_i32_0 : i32, i32
  }
  func.func @transform_6(%arg0: i32) -> (i32, i32) {
    %c0_i32 = arith.constant 0 : i32
    %c0_i32_0 = arith.constant 0 : i32
    %c0_i32_1 = arith.constant 0 : i32
    return %c0_i32, %c0_i32_0 : i32, i32
  }
  func.func @transform_7(%arg0: i32) -> (i32, i32) {
    %c0_i32 = arith.constant 0 : i32
    %c0_i32_0 = arith.constant 0 : i32
    %c0_i32_1 = arith.constant 0 : i32
    return %c0_i32, %c0_i32_0 : i32, i32
  }
  func.func @transform_8(%arg0: i32) -> (i32, i32) {
    %c0_i32 = arith.constant 0 : i32
    %c0_i32_0 = arith.constant 0 : i32
    %c0_i32_1 = arith.constant 0 : i32
    return %c0_i32, %c0_i32_0 : i32, i32
  }
  func.func @transform_9(%arg0: i32) -> (i32, i32) {
    %c0_i32 = arith.constant 0 : i32
    %c0_i32_0 = arith.constant 0 : i32
    return %arg0, %c0_i32 : i32, i32
  }
}

</mosaic_0001>

<bundles_post_ra>
// kernel: tpu_custom_call.1
= control target key start
LH: loop header
LB: loop body
LE: loop exit
PB: predicated region body
PF: predicated region fallthrough
CT: control target
= control target key end

     0   :  { %14 = vsyncpa [#allocation3], 0  ;;  %s1531_s0 = inlined_call_operand.hbm [shape: bf16[16,16], index: 0, kind: input, shape index: {}]   ;;  %s1532_s1 = inlined_call_operand.hbm [shape: bf16[16,256], index: 1, kind: input, shape index: {}]   ;;  %s1533_s2 = inlined_call_operand.vmem [shape: bf16[1,256], index: 2, kind: input, shape index: {}]   ;;  %s1534_s3 = inlined_call_operand.hbm [shape: bf16[256,256], index: 3, kind: input, shape index: {}]   ;;  %s1535_s4 = inlined_call_operand.vmem [shape: bf16[1,256], index: 4, kind: input, shape index: {}]   ;;  %s1536_s5 = inlined_call_operand.hbm [shape: bf16[256,256], index: 5, kind: input, shape index: {}]   ;;  %s1537_s6 = inlined_call_operand.vmem [shape: bf16[1,256], index: 6, kind: input, shape index: {}]   ;;  %s1538_s7 = inlined_call_operand.hbm [shape: bf16[256,128], index: 7, kind: input, shape index: {}]   ;;  %s1539_s8 = inlined_call_operand.vmem [shape: bf16[1,128], index: 8, kind: input, shape index: {}]   ;;  %s1540_s9 = inlined_call_operand.hbm [shape: f32[16,128], index: 9, kind: output, shape index: {}]  }
   0x1   :  { %15 = vsyncpa [#allocation6], 0 }
   0x2   :  { %16 = vsyncpa [#allocation9], 0 }
   0x3   :  { %17 = vsyncpa [#allocation4], 0  ;;  %s1350_s30 = smov [#allocation5]   ;;  %s1210_s13 = scalar_lea.hbm %s1532_s1, 256 }
   0x4   :  { %s35_s10 = sshll.u32 %s1350_s30, 4  ;;  %p1211_p0 = scmp.ne.s32.totalorder %s1532_s1, %s1210_s13  ;;  %s36_s10 = int_to_ptr.vmem [resolvable:$true] %s35_s10 }
   0x5   :  { %p1214_p1 = scmp.lt.u32.totalorder %s1210_s13, %s1532_s1 }
   0x7   :  { %p1216_p2 = pnand %p1214_p1, %p1211_p0 }
   0x9   :  { %1219 = shalt.err (!%p1216_p2)
}
   0xa   :  { %s1220_s18 = scalar_lea.vmem %s36_s10, 256  ;;  %p1225_p4 = scmp.lt.s32.totalorder %s36_s10, %s36_s10 }
   0xb   :  { %p1221_p3 = scmp.ne.s32.totalorder %s36_s10, %s1220_s18  ;;  %p1226_p5 = scmp.lt.s32.totalorder %s1220_s18, %s1220_s18 }
   0xd   :  { %p1227_p6 = por %p1226_p5, %p1225_p4 }
   0xf   :  { %p1228_p7 = pnand %p1227_p6, %p1221_p3 }
  0x11   :  { %1231 = shalt.err (!%p1228_p7)
}
  0x12   :  { %s1351_s19 = smov 128   ;;  %s1352_s20 = smov 8  }
  0x13   :  { %41 = dma.hbm_to_vmem [thread:$0]  %s1532_s1, 256, %s36_s10, [#allocation6], %s1351_s19, %s1351_s19, %s1352_s20  }
  0x14   :  { %s1353_s23 = smov [#allocation8]   ;;  %s1354_s25 = smov [#allocation2]  }
  0x15   :  { %s63_s24 = sshll.u32 %s1353_s23, 4  ;;  %s23_s26 = sshll.u32 %s1354_s25, 4  ;;  %s64_s24 = int_to_ptr.vmem [resolvable:$true] %s63_s24  ;;  %s24_s26 = int_to_ptr.vmem [resolvable:$true] %s23_s26 }
  0x16   :  { %s1232_s29 = scalar_lea.hbm %s1536_s5, 4096 }
  0x17   :  { %p1233_p8 = scmp.ne.s32.totalorder %s1536_s5, %s1232_s29  ;;  %p1236_p9 = scmp.lt.u32.totalorder %s1232_s29, %s1536_s5 }
  0x19   :  { %p1238_p10 = pnand %p1236_p9, %p1233_p8 }
  0x1b   :  { %1241 = shalt.err (!%p1238_p10)
}
  0x1c   :  { %s1242_s1 = scalar_lea.vmem %s64_s24, 4096  ;;  %p1247_p12 = scmp.lt.s32.totalorder %s64_s24, %s64_s24 }
  0x1d   :  { %p1243_p11 = scmp.ne.s32.totalorder %s64_s24, %s1242_s1  ;;  %p1248_p13 = scmp.lt.s32.totalorder %s1242_s1, %s1242_s1 }
  0x1f   :  { %p1249_p0 = por %p1248_p13, %p1247_p12 }
  0x21   :  { %p1250_p1 = pnand %p1249_p0, %p1243_p11 }
  0x23   :  { %1253 = shalt.err (!%p1250_p1)
}
  0x24   :  { %69 = dma.hbm_to_vmem [thread:$0]  %s1536_s5, 4096, %s64_s24, [#allocation9], %s1351_s19, %s1351_s19, %s1352_s20  }
  0x25   :  { %s1254_s17 = scalar_lea.hbm %s1531_s0, 128 }
  0x26   :  { %p1255_p2 = scmp.ne.s32.totalorder %s1531_s0, %s1254_s17  ;;  %p1258_p3 = scmp.lt.u32.totalorder %s1254_s17, %s1531_s0 }
  0x28   :  { %p1260_p4 = pnand %p1258_p3, %p1255_p2 }
  0x2a   :  { %1263 = shalt.err (!%p1260_p4)
}
  0x2b   :  { %s1264_s25 = scalar_lea.vmem %s24_s26, 128  ;;  %p1269_p6 = scmp.lt.s32.totalorder %s24_s26, %s24_s26 }
  0x2c   :  { %p1265_p5 = scmp.ne.s32.totalorder %s24_s26, %s1264_s25  ;;  %p1270_p7 = scmp.lt.s32.totalorder %s1264_s25, %s1264_s25 }
  0x2e   :  { %p1271_p8 = por %p1270_p7, %p1269_p6 }
  0x30   :  { %p1272_p9 = pnand %p1271_p8, %p1265_p5 }
  0x32   :  { %1275 = shalt.err (!%p1272_p9)
}
  0x33   :  { %s1355_s5 = smov 64   ;;  %s1356_s24 = smov 4  }
  0x34   :  { %29 = dma.hbm_to_vmem [thread:$0]  %s1531_s0, 128, %s24_s26, [#allocation3], %s1355_s5, %s1355_s5, %s1356_s24  }
  0x35   :  { %s1357_s29 = smov [#allocation7]   ;;  %s1358_s11 = smov [#allocation10]  }
  0x36   :  { %s49_s30 = sshll.u32 %s1357_s29, 4  ;;  %s77_s12 = sshll.u32 %s1358_s11, 4  ;;  %s50_s30 = int_to_ptr.vmem [resolvable:$true] %s49_s30  ;;  %s78_s12 = int_to_ptr.vmem [resolvable:$true] %s77_s12 }
  0x37   :  { %s1276_s10 = scalar_lea.hbm %s1534_s3, 4096 }
  0x38   :  { %p1277_p10 = scmp.ne.s32.totalorder %s1534_s3, %s1276_s10  ;;  %p1280_p11 = scmp.lt.u32.totalorder %s1276_s10, %s1534_s3 }
  0x3a   :  { %p1282_p12 = pnand %p1280_p11, %p1277_p10 }
  0x3c   :  { %1285 = shalt.err (!%p1282_p12)
}
  0x3d   :  { %s1286_s0 = scalar_lea.vmem %s50_s30, 4096  ;;  %p1291_p0 = scmp.lt.s32.totalorder %s50_s30, %s50_s30 }
  0x3e   :  { %p1287_p13 = scmp.ne.s32.totalorder %s50_s30, %s1286_s0  ;;  %p1292_p1 = scmp.lt.s32.totalorder %s1286_s0, %s1286_s0 }
  0x40   :  { %p1293_p2 = por %p1292_p1, %p1291_p0 }
  0x42   :  { %p1294_p3 = pnand %p1293_p2, %p1287_p13 }
  0x44   :  { %1297 = shalt.err (!%p1294_p3)
}
  0x45   :  { %55 = dma.hbm_to_vmem [thread:$0]  %s1534_s3, 4096, %s50_s30, [#allocation6], %s1351_s19, %s1351_s19, %s1352_s20  }
  0x46   :  { %s1298_s23 = scalar_lea.hbm %s1538_s7, 2048 }
  0x47   :  { %p1299_p4 = scmp.ne.s32.totalorder %s1538_s7, %s1298_s23  ;;  %p1302_p5 = scmp.lt.u32.totalorder %s1298_s23, %s1538_s7 }
  0x49   :  { %p1304_p6 = pnand %p1302_p5, %p1299_p4 }
  0x4b   :  { %1307 = shalt.err (!%p1304_p6)
}
  0x4c   :  { %s1308_s11 = scalar_lea.vmem %s78_s12, 2048  ;;  %p1313_p8 = scmp.lt.s32.totalorder %s78_s12, %s78_s12 }
  0x4d   :  { %p1309_p7 = scmp.ne.s32.totalorder %s78_s12, %s1308_s11  ;;  %p1314_p9 = scmp.lt.s32.totalorder %s1308_s11, %s1308_s11 }
  0x4f   :  { %p1315_p10 = por %p1314_p9, %p1313_p8 }
  0x51   :  { %p1316_p11 = pnand %p1315_p10, %p1309_p7 }
  0x53   :  { %1319 = shalt.err (!%p1316_p11)
}
  0x54   :  { %83 = dma.hbm_to_vmem [thread:$0]  %s1538_s7, 2048, %s78_s12, [#allocation9], %s1355_s5, %s1355_s5, %s1356_s24  }
  0x55   :  { %1342 = dma.done.wait [#allocation3], 128  }
  0x56   :  { %1343 = vsyncadd [#allocation3], 4294967168 }
  0x57   :  { %1344 = dma.done.wait [#allocation6], 4352  }
  0x58   :  { %1345 = vsyncadd [#allocation6], 4294962944 }
  0x59   :  { %1346 = dma.done.wait [#allocation9], 6144  }
  0x5a   :  { %1347 = vsyncadd [#allocation9], 4294961152  ;;  %v1359_v0 = vmov 0   ;;  %v1094_v1 = vld [vmem:[#allocation5 + $0x4] ss:$8 sps:$4 sm:$0xff]   ;;  %v1097_v3 = vld [vmem:[#allocation2] sm:$0xff]  }
  0x5b   :  { %158 = vmatprep.mubr.bf16.mxu0 %v1359_v0  ;;  %v1096_v2 = vld [vmem:[#allocation5] ss:$8 sps:$4 sm:$0xff]   ;;  %126 = vmatprep.subr.bf16.mxu0 %v1094_v1  ;;  %vm122_vm0 = vcmask 130048   ;;  %v1098_v4 = vld [vmem:[#allocation7 + $0x4] ss:$8 sps:$4 sm:$0xff]   ;;  %v184_v0 = vlaneseq  ;;  %s1361_s1 = smov [#allocation11]  }
  0x5c   :  { %127 = vmatpush1.bf16.msra.mxu0 %v1096_v2  ;;  %v1100_v5 = vld [vmem:[#allocation7] ss:$8 sps:$4 sm:$0xff]   ;;  %v1101_v6 = vld [vmem:[#allocation7 + $0x14] ss:$8 sps:$4 sm:$0xff]   ;;  %407 = vmatprep.subr.bf16.mxu1 %v1098_v4  ;;  %v1103_v7 = vld [vmem:[#allocation7 + $0x10] ss:$8 sps:$4 sm:$0xff]  }
  0x5d   :  { %408 = vmatpush1.bf16.msra.mxu1 %v1100_v5  ;;  %v1104_v8 = vld [vmem:[#allocation7 + $0x24] ss:$8 sps:$4 sm:$0xff]   ;;  %v1106_v9 = vld [vmem:[#allocation7 + $0x20] ss:$8 sps:$4 sm:$0xff]   ;;  %v1107_v10 = vld [vmem:[#allocation7 + $0x34] ss:$8 sps:$4 sm:$0xff]  }
  0x5e   :  { %409 = vmatprep.subr.bf16.mxu1 %v1101_v6  ;;  %v1109_v11 = vld [vmem:[#allocation7 + $0x30] ss:$8 sps:$4 sm:$0xff]   ;;  %v1110_v12 = vld [vmem:[#allocation7 + $0x44] ss:$8 sps:$4 sm:$0xff]   ;;  %v1112_v13 = vld [vmem:[#allocation7 + $0x40] ss:$8 sps:$4 sm:$0xff]  }
  0x5f   :  { %976 = vmatmul.mubr.msk.bf16.vlgmr.msra.gmra.mrb[0].mxu0 %vm122_vm0, %v1097_v3  ;;  %v1113_v14 = vld [vmem:[#allocation7 + $0x54] ss:$8 sps:$4 sm:$0xff]   ;;  %v1115_v15 = vld [vmem:[#allocation7 + $0x50] ss:$8 sps:$4 sm:$0xff]   ;;  %v1116_v16 = vld [vmem:[#allocation7 + $0x64] ss:$8 sps:$4 sm:$0xff]  }
  0x60   :  { %v1118_v17 = vld [vmem:[#allocation7 + $0x60] ss:$8 sps:$4 sm:$0xff]   ;;  %v1119_v18 = vld [vmem:[#allocation7 + $0x74] ss:$8 sps:$4 sm:$0xff]   ;;  %v1121_v19 = vld [vmem:[#allocation7 + $0x70] ss:$8 sps:$4 sm:$0xff]  }
  0x61   :  { %410 = vmatpush1.bf16.msra.mxu1 %v1103_v7  ;;  %v1122_v20 = vld [vmem:[#allocation7 + $0x84] ss:$8 sps:$4 sm:$0xff]   ;;  %v1124_v21 = vld [vmem:[#allocation7 + $0x80] ss:$8 sps:$4 sm:$0xff]   ;;  %v1125_v22 = vld [vmem:[#allocation7 + $0x94] ss:$8 sps:$4 sm:$0xff]  }
  0x62   :  { %411 = vmatprep.subr.bf16.mxu1 %v1104_v8  ;;  %v1127_v23 = vld [vmem:[#allocation7 + $0x90] ss:$8 sps:$4 sm:$0xff]   ;;  %v1128_v24 = vld [vmem:[#allocation7 + $0xa4] ss:$8 sps:$4 sm:$0xff]   ;;  %v1130_v25 = vld [vmem:[#allocation7 + $0xa0] ss:$8 sps:$4 sm:$0xff]  }
  0x63   :  { %v1131_v26 = vld [vmem:[#allocation7 + $0xb4] ss:$8 sps:$4 sm:$0xff]   ;;  %v1133_v27 = vld [vmem:[#allocation7 + $0xb0] ss:$8 sps:$4 sm:$0xff]   ;;  %v1134_v28 = vld [vmem:[#allocation7 + $0xc4] ss:$8 sps:$4 sm:$0xff]  }
  0x64   :  { %v1136_v29 = vld [vmem:[#allocation7 + $0xc0] ss:$8 sps:$4 sm:$0xff]   ;;  %v1137_v30 = vld [vmem:[#allocation7 + $0xd4] ss:$8 sps:$4 sm:$0xff]   ;;  %v1139_v31 = vld [vmem:[#allocation7 + $0xd0] ss:$8 sps:$4 sm:$0xff]  }
  0x65   :  { %412 = vmatpush1.bf16.msra.mxu1 %v1106_v9  ;;  %v1140_v32 = vld [vmem:[#allocation7 + $0xe4] ss:$8 sps:$4 sm:$0xff]   ;;  %v1142_v33 = vld [vmem:[#allocation7 + $0xe0] ss:$8 sps:$4 sm:$0xff]   ;;  %v1143_v34 = vld [vmem:[#allocation7 + $0xf4] ss:$8 sps:$4 sm:$0xff]  }
  0x66   :  { %413 = vmatprep.subr.bf16.mxu1 %v1107_v10  ;;  %v1145_v35 = vld [vmem:[#allocation7 + $0xf0] ss:$8 sps:$4 sm:$0xff]   ;;  %v1146_v36 = vld [vmem:[#allocation8] ss:$8 sps:$4 sm:$0xff]   ;;  %v1148_v37 = vld [vmem:[#allocation8 + $0x4] ss:$8 sps:$4 sm:$0xff]  }
  0x67   :  { %v1151_v38 = vld [vmem:[#allocation8 + $0x14] ss:$8 sps:$4 sm:$0xff]   ;;  %688 = vmatprep.subr.bf16.mxu0 %v1148_v37  ;;  %v1149_v39 = vld [vmem:[#allocation8 + $0x10] ss:$8 sps:$4 sm:$0xff]   ;;  %v1154_v40 = vld [vmem:[#allocation8 + $0x24] ss:$8 sps:$4 sm:$0xff]  }
  0x68   :  { %689 = vmatpush1.bf16.msra.mxu0 %v1146_v36  ;;  %v1152_v41 = vld [vmem:[#allocation8 + $0x20] ss:$8 sps:$4 sm:$0xff]   ;;  %v1157_v42 = vld [vmem:[#allocation8 + $0x34] ss:$8 sps:$4 sm:$0xff]   ;;  %v1155_v43 = vld [vmem:[#allocation8 + $0x30] ss:$8 sps:$4 sm:$0xff]  }
  0x69   :  { %414 = vmatpush1.bf16.msra.mxu1 %v1109_v11  ;;  %690 = vmatprep.subr.bf16.mxu0 %v1151_v38  ;;  %v1160_v44 = vld [vmem:[#allocation8 + $0x44] ss:$8 sps:$4 sm:$0xff]   ;;  %v1158_v45 = vld [vmem:[#allocation8 + $0x40] ss:$8 sps:$4 sm:$0xff]   ;;  %v1163_v46 = vld [vmem:[#allocation8 + $0x54] ss:$8 sps:$4 sm:$0xff]  }
  0x6a   :  { %415 = vmatprep.subr.bf16.mxu1 %v1110_v12  ;;  %v1161_v47 = vld [vmem:[#allocation8 + $0x50] ss:$8 sps:$4 sm:$0xff]   ;;  %v1166_v48 = vld [vmem:[#allocation8 + $0x64] ss:$8 sps:$4 sm:$0xff]   ;;  %v1164_v49 = vld [vmem:[#allocation8 + $0x60] ss:$8 sps:$4 sm:$0xff]  }
  0x6b   :  { %v1169_v50 = vld [vmem:[#allocation8 + $0x74] ss:$8 sps:$4 sm:$0xff]   ;;  %v1167_v51 = vld [vmem:[#allocation8 + $0x70] ss:$8 sps:$4 sm:$0xff]   ;;  %v1172_v52 = vld [vmem:[#allocation8 + $0x84] ss:$8 sps:$4 sm:$0xff]  }
  0x6c   :  { %691 = vmatpush1.bf16.msra.mxu0 %v1149_v39  ;;  %v1170_v53 = vld [vmem:[#allocation8 + $0x80] ss:$8 sps:$4 sm:$0xff]   ;;  %v1175_v54 = vld [vmem:[#allocation8 + $0x94] ss:$8 sps:$4 sm:$0xff]   ;;  %v1173_v55 = vld [vmem:[#allocation8 + $0x90] ss:$8 sps:$4 sm:$0xff]  }
  0x6d   :  { %416 = vmatpush1.bf16.msra.mxu1 %v1112_v13  ;;  %692 = vmatprep.subr.bf16.mxu0 %v1154_v40  ;;  %v1178_v56 = vld [vmem:[#allocation8 + $0xa4] ss:$8 sps:$4 sm:$0xff]   ;;  %v1176_v57 = vld [vmem:[#allocation8 + $0xa0] ss:$8 sps:$4 sm:$0xff]   ;;  %v1181_v58 = vld [vmem:[#allocation8 + $0xb4] ss:$8 sps:$4 sm:$0xff]  }
  0x6e   :  { %417 = vmatprep.subr.bf16.mxu1 %v1113_v14  ;;  %v1179_v59 = vld [vmem:[#allocation8 + $0xb0] ss:$8 sps:$4 sm:$0xff]   ;;  %v1184_v60 = vld [vmem:[#allocation8 + $0xc4] ss:$8 sps:$4 sm:$0xff]   ;;  %v1182_v61 = vld [vmem:[#allocation8 + $0xc0] ss:$8 sps:$4 sm:$0xff]  }
  0x6f   :  { %v1360_v62 = vmov 1966171168   ;;  %v185_v2 = vshrl.u32 %v184_v0, 7  ;;  %v1199_v36 = vld [vmem:[#allocation10 + $0x10] sm:$0xff]   ;;  %v1200_v37 = vld [vmem:[#allocation10 + $0x58] sm:$0xff]   ;;  %v1202_v39 = vld [vmem:[#allocation10 + $0x60] sm:$0xff]  }
  0x70   :  { %693 = vmatpush1.bf16.msra.mxu0 %v1152_v41  ;;  %v182_v63 = vunpack.c.l.s4 %v1360_v62  ;;  %v977_v3 = vld.sshfl [vmem:[%s1533_s2] sm:$0x11 pattern:$0x75316420]  ;;  %v1201_v38 = vld [vmem:[#allocation10 + $0x18] sm:$0xff]   ;;  %v1203_v40 = vld [vmem:[#allocation10 + $0x20] sm:$0xff]  }
  0x71   :  { %418 = vmatpush1.bf16.msra.mxu1 %v1115_v15  ;;  %694 = vmatprep.subr.bf16.mxu0 %v1157_v42  ;;  %v180_v5 = vcombine.high %v977_v3, %v977_v3  ;;  %v1494_v9 = vsub.s32 0, %v185_v2  ;;  %v1010_v41 = vld.sshfl [vmem:[%s1535_s4] sm:$0x11 pattern:$0x75316420]  ;;  %v1207_v0 = vld [vmem:[#allocation10 + $0x30] sm:$0xff]  }
  0x72   :  { %419 = vmatprep.subr.bf16.mxu1 %v1116_v16  ;;  %v183_v1 = vunpack.c.0.s8 %v182_v63  ;;  %v461_v42 = vcombine.high %v1010_v41, %v1010_v41  ;;  %v1205_v62 = vld [vmem:[#allocation10 + $0x28] sm:$0xff]   ;;  %v1206_v63 = vld [vmem:[#allocation10 + $0x70] sm:$0xff]   ;;  %s959_s10 = sshll.u32 %s1361_s1, 4  ;;  %s960_s10 = int_to_ptr.vmem [resolvable:$true] %s959_s10 }
  0x73   :  { %s1320_s14 = scalar_lea.vmem %s960_s10, 256  ;;  %p1325_p13 = scmp.lt.s32.totalorder %s960_s10, %s960_s10 }
  0x74   :  { %695 = vmatpush1.bf16.msra.mxu0 %v1155_v43  ;;  %v1490_v4 = vsub.s32 %v183_v1, %v185_v2  ;;  %v1208_v1 = vld [vmem:[#allocation10 + $0x78] sm:$0xff]   ;;  %p1321_p12 = scmp.ne.s32.totalorder %s960_s10, %s1320_s14  ;;  %p1326_p0 = scmp.lt.s32.totalorder %s1320_s14, %s1320_s14 }
  0x75   :  { %420 = vmatpush1.bf16.msra.mxu1 %v1118_v17  ;;  %696 = vmatprep.subr.bf16.mxu0 %v1160_v44  ;;  %v1209_v2 = vld [vmem:[#allocation10 + $0x38] sm:$0xff]  }
  0x76   :  { %421 = vmatprep.subr.bf16.mxu1 %v1119_v18  ;;  %v187_v6 = vrot.slane %v977_v3, %v1490_v4  ;;  %v194_v7 = vrot.slane %v180_v5, %v1490_v4  ;;  %v468_v43 = vrot.slane %v1010_v41, %v1490_v4  ;;  %v475_v44 = vrot.slane %v461_v42, %v1490_v4  ;;  %v1043_v3 = vld.sshfl [vmem:[%s1537_s6] sm:$0x11 pattern:$0x75316420]  ;;  %p1327_p1 = por %p1326_p0, %p1325_p13 }
  0x77   :  { %v742_v5 = vcombine.high %v1043_v3, %v1043_v3 }
  0x78   :  { %697 = vmatpush1.bf16.msra.mxu0 %v1158_v45  ;;  %v196_v8 = vpack.i.b16 %v187_v6, %v187_v6  ;;  %v203_v10 = vpack.i.b16 %v194_v7, %v194_v7  ;;  %v477_v45 = vpack.i.b16 %v468_v43, %v468_v43  ;;  %v749_v6 = vrot.slane %v1043_v3, %v1490_v4  ;;  %p1328_p2 = pnand %p1327_p1, %p1321_p12 }
  0x79   :  { %422 = vmatpush1.bf16.msra.mxu1 %v1121_v19  ;;  %698 = vmatprep.subr.bf16.mxu0 %v1163_v46  ;;  %v484_v46 = vpack.i.b16 %v475_v44, %v475_v44  ;;  %v756_v7 = vrot.slane %v742_v5, %v1490_v4  ;;  %v809_v4 = vld [vmem:[%s1539_s8] sm:$0x1] }
  0x7a   :  { %423 = vmatprep.subr.bf16.mxu1 %v1122_v20  ;;  %v201_v13 = vrot.slane %v196_v8, %v1494_v9  ;;  %v208_v15 = vrot.slane %v203_v10, %v1494_v9  ;;  %v758_v8 = vpack.i.b16 %v749_v6, %v749_v6 }
  0x7b   :  { %v765_v10 = vpack.i.b16 %v756_v7, %v756_v7 }
  0x7c   :  { %699 = vmatpush1.bf16.msra.mxu0 %v1161_v47 }
  0x7d   :  { %424 = vmatpush1.bf16.msra.mxu1 %v1124_v21  ;;  %700 = vmatprep.subr.bf16.mxu0 %v1166_v48 }
  0x7e   :  { %425 = vmatprep.subr.bf16.mxu1 %v1125_v22 }
  0x80   :  { %701 = vmatpush1.bf16.msra.mxu0 %v1164_v49  ;;  %v482_v49 = vrot.slane %v477_v45, %v1494_v9 }
  0x81   :  { %426 = vmatpush1.bf16.msra.mxu1 %v1127_v23  ;;  %702 = vmatprep.subr.bf16.mxu0 %v1169_v50 }
  0x82   :  { %427 = vmatprep.subr.bf16.mxu1 %v1128_v24 }
  0x84   :  { %703 = vmatpush1.bf16.msra.mxu0 %v1167_v51  ;;  %v489_v51 = vrot.slane %v484_v46, %v1494_v9 }
  0x85   :  { %428 = vmatpush1.bf16.msra.mxu1 %v1130_v25  ;;  %704 = vmatprep.subr.bf16.mxu0 %v1172_v52  ;;  %v1187_v25 = vld [vmem:[#allocation8 + $0xd4] ss:$8 sps:$4 sm:$0xff]  }
  0x86   :  { %429 = vmatprep.subr.bf16.mxu1 %v1131_v26  ;;  %v1185_v26 = vld [vmem:[#allocation8 + $0xd0] ss:$8 sps:$4 sm:$0xff]  }
  0x88   :  { %705 = vmatpush1.bf16.msra.mxu0 %v1170_v53 }
  0x89   :  { %430 = vmatpush1.bf16.msra.mxu1 %v1133_v27  ;;  %706 = vmatprep.subr.bf16.mxu0 %v1175_v54  ;;  %v1190_v27 = vld [vmem:[#allocation8 + $0xe4] ss:$8 sps:$4 sm:$0xff]  }
  0x8a   :  { %431 = vmatprep.subr.bf16.mxu1 %v1134_v28  ;;  %v1188_v28 = vld [vmem:[#allocation8 + $0xe0] ss:$8 sps:$4 sm:$0xff]  }
  0x8c   :  { %707 = vmatpush1.bf16.msra.mxu0 %v1173_v55 }
  0x8d   :  { %432 = vmatpush1.bf16.msra.mxu1 %v1136_v29  ;;  %708 = vmatprep.subr.bf16.mxu0 %v1178_v56  ;;  %v1193_v29 = vld [vmem:[#allocation8 + $0xf4] ss:$8 sps:$4 sm:$0xff]  }
  0x8e   :  { %433 = vmatprep.subr.bf16.mxu1 %v1137_v30  ;;  %v1191_v30 = vld [vmem:[#allocation8 + $0xf0] ss:$8 sps:$4 sm:$0xff]  }
  0x90   :  { %709 = vmatpush1.bf16.msra.mxu0 %v1176_v57 }
  0x91   :  { %434 = vmatpush1.bf16.msra.mxu1 %v1139_v31  ;;  %710 = vmatprep.subr.bf16.mxu0 %v1181_v58  ;;  %v1194_v31 = vld [vmem:[#allocation10 + $0x40] sm:$0xff]  }
  0x92   :  { %435 = vmatprep.subr.bf16.mxu1 %v1140_v32  ;;  %v1195_v32 = vld [vmem:[#allocation10] sm:$0xff]  }
  0x94   :  { %711 = vmatpush1.bf16.msra.mxu0 %v1179_v59 }
  0x95   :  { %436 = vmatpush1.bf16.msra.mxu1 %v1142_v33  ;;  %712 = vmatprep.subr.bf16.mxu0 %v1184_v60  ;;  %v1196_v33 = vld [vmem:[#allocation10 + $0x48] sm:$0xff]  }
  0x96   :  { %437 = vmatprep.subr.bf16.mxu1 %v1143_v34  ;;  %v1197_v34 = vld [vmem:[#allocation10 + $0x8] sm:$0xff]  }
  0x98   :  { %713 = vmatpush1.bf16.msra.mxu0 %v1182_v61  ;;  %v1204_v61 = vld [vmem:[#allocation10 + $0x68] sm:$0xff]  }
  0x99   :  { %438 = vmatpush1.bf16.msra.mxu1 %v1145_v35  ;;  %714 = vmatprep.subr.bf16.mxu0 %v1187_v25  ;;  %v1198_v35 = vld [vmem:[#allocation10 + $0x50] sm:$0xff]   ;;  %v810_v25 = vunpack.c.l.bf16 %v809_v4 }
  0x9a   :  { %1060 = vmatprep.subr.bf16.mxu1 %v1194_v31 }
  0x9c   :  { %715 = vmatpush1.bf16.msra.mxu0 %v1185_v26 }
  0x9d   :  { %716 = vmatprep.subr.bf16.mxu0 %v1190_v27  ;;  %v814_v27 = vrot.slane %v810_v25, %v1494_v9 }
  0xa0   :  { %717 = vmatpush1.bf16.msra.mxu0 %v1188_v28 }
  0xa1   :  { %718 = vmatprep.subr.bf16.mxu0 %v1193_v29 }
  0xa4   :  { %719 = vmatpush1.bf16.msra.mxu0 %v1191_v30 }
 0x132   :  { %v160_v11 = vpop.f32.mrb[0].mxu0 }
 0x133   :  { %v162_v12 = vpop.f32.mrb[1].mxu0 }
 0x134   :  { %v164_v14 = vpop.f32.mrb[2].mxu0 }
 0x135   :  { %v169_v16 = vpack.c.bf16 %v164_v14, %v160_v11  ;;  %v166_v17 = vpop.f32.mrb[3].mxu0 }
 0x136   :  { %v170_v18 = vpack.c.bf16 %v166_v17, %v162_v12 }
 0x137   :  { %v209_v19 = vadd.bf16 %v201_v13, %v169_v16  ;;  %v763_v13 = vrot.slane %v758_v8, %v1494_v9 }
 0x138   :  { %v210_v20 = vadd.bf16 %v208_v15, %v170_v18  ;;  %v770_v15 = vrot.slane %v765_v10, %v1494_v9 }
 0x139   :  { %v211_v21 = vmul.bf16 1009007652, %v209_v19 }
 0x13a   :  { %v212_v22 = vmul.bf16 1009007652, %v210_v20 }
 0x13b   :  { %v213_v24 = vmax.bf16 %v211_v21, %v209_v19 }
 0x13c   :  { %v214_v23 = vmax.bf16 %v212_v22, %v210_v20 }
 0x13e   :  { %439 = vmatprep.mubr.bf16.mxu1 %v214_v23 }
 0x13f   :  { %440 = vmatmul.mubr.bf16.vlgmr.msra.gmra.mrb[0].mxu1 %v213_v24 }
 0x140   :  { %1061 = vmatpush3.bf16.msra.mxu1 %v1195_v32 }
 0x141   :  { %1062 = vmatprep.subr.bf16.mxu1 %v1196_v33 }
 0x144   :  { %1063 = vmatpush3.bf16.msra.mxu1 %v1197_v34 }
 0x145   :  { %1064 = vmatprep.subr.bf16.mxu1 %v1198_v35 }
 0x148   :  { %1065 = vmatpush3.bf16.msra.mxu1 %v1199_v36 }
 0x149   :  { %1066 = vmatprep.subr.bf16.mxu1 %v1200_v37 }
 0x14c   :  { %1067 = vmatpush3.bf16.msra.mxu1 %v1201_v38 }
 0x14d   :  { %1068 = vmatprep.subr.bf16.mxu1 %v1202_v39 }
 0x150   :  { %1069 = vmatpush3.bf16.msra.mxu1 %v1203_v40 }
 0x151   :  { %1070 = vmatprep.subr.bf16.mxu1 %v1204_v61 }
 0x154   :  { %1071 = vmatpush3.bf16.msra.mxu1 %v1205_v62 }
 0x155   :  { %1072 = vmatprep.subr.bf16.mxu1 %v1206_v63 }
 0x158   :  { %1073 = vmatpush3.bf16.msra.mxu1 %v1207_v0 }
 0x159   :  { %1074 = vmatprep.subr.bf16.mxu1 %v1208_v1 }
 0x15c   :  { %1075 = vmatpush3.bf16.msra.mxu1 %v1209_v2 }
 0x212   :  { %v441_v47 = vpop.f32.mrb[0].mxu1 }
 0x213   :  { %v443_v48 = vpop.f32.mrb[1].mxu1 }
 0x214   :  { %v445_v50 = vpop.f32.mrb[2].mxu1 }
 0x215   :  { %v450_v52 = vpack.c.bf16 %v445_v50, %v441_v47  ;;  %v447_v53 = vpop.f32.mrb[3].mxu1 }
 0x216   :  { %v451_v54 = vpack.c.bf16 %v447_v53, %v443_v48 }
 0x217   :  { %v490_v55 = vadd.bf16 %v482_v49, %v450_v52 }
 0x218   :  { %v491_v56 = vadd.bf16 %v489_v51, %v451_v54 }
 0x219   :  { %v492_v57 = vmul.bf16 1009007652, %v490_v55 }
 0x21a   :  { %v493_v58 = vmul.bf16 1009007652, %v491_v56 }
 0x21b   :  { %v494_v60 = vmax.bf16 %v492_v57, %v490_v55 }
 0x21c   :  { %v495_v59 = vmax.bf16 %v493_v58, %v491_v56 }
 0x21e   :  { %720 = vmatprep.mubr.bf16.mxu0 %v495_v59 }
 0x21f   :  { %721 = vmatmul.mubr.bf16.vlgmr.msra.gmra.mrb[4].mxu0 %v494_v60 }
 0x2f2   :  { %v722_v11 = vpop.f32.mrb[4].mxu0 }
 0x2f3   :  { %v724_v12 = vpop.f32.mrb[5].mxu0 }
 0x2f4   :  { %v726_v14 = vpop.f32.mrb[6].mxu0 }
 0x2f5   :  { %v731_v16 = vpack.c.bf16 %v726_v14, %v722_v11  ;;  %v728_v17 = vpop.f32.mrb[7].mxu0 }
 0x2f6   :  { %v732_v18 = vpack.c.bf16 %v728_v17, %v724_v12 }
 0x2f7   :  { %v771_v19 = vadd.bf16 %v763_v13, %v731_v16 }
 0x2f8   :  { %v772_v20 = vadd.bf16 %v770_v15, %v732_v18 }
 0x2f9   :  { %v773_v21 = vmul.bf16 1009007652, %v771_v19 }
 0x2fa   :  { %v774_v22 = vmul.bf16 1009007652, %v772_v20 }
 0x2fb   :  { %v775_v24 = vmax.bf16 %v773_v21, %v771_v19 }
 0x2fc   :  { %v776_v23 = vmax.bf16 %v774_v22, %v772_v20 }
 0x2fe   :  { %943 = vmatprep.mubr.bf16.mxu1 %v776_v23 }
 0x2ff   :  { %944 = vmatmul.mubr.bf16.vlgmr.msra.gmra.mrb[4].mxu1 %v775_v24 }
 0x3d2   :  { %v1076_v26 = vpop.f32.mrb[4].mxu1 }
 0x3d3   :  { %v1077_v28 = vpop.f32.mrb[5].mxu1 }
 0x3d4   :  { %v1078_v29 = vadd.f32 %v1077_v28, %v1076_v26  ;;  %v1079_v30 = vpop.f32.mrb[6].mxu1 }
 0x3d5   :  { %v1080_v31 = vpop.f32.mrb[7].mxu1 }
 0x3d6   :  { %v946_v32 = vadd.f32 %v1078_v29, %v814_v27  ;;  %v1081_v33 = vadd.f32 %v1080_v31, %v1079_v30 }
 0x3d8   :  { %952 = vst [vmem:[#allocation11] sm:$0xff] %v946_v32  ;;  %v949_v34 = vadd.f32 %v1081_v33, %v814_v27 }
 0x3da   :  { %953 = vst [vmem:[#allocation11 + $0x8] sm:$0xff] %v949_v34 }
 0x3db   :  { %1331 = shalt.err (!%p1328_p2)
}
 0x3dc   :  { %s1332_s16 = scalar_lea.hbm %s1540_s9, 256 }
 0x3dd   :  { %p1333_p3 = scmp.ne.s32.totalorder %s1540_s9, %s1332_s16  ;;  %p1336_p4 = scmp.lt.u32.totalorder %s1332_s16, %s1540_s9 }
 0x3df   :  { %p1338_p5 = pnand %p1336_p4, %p1333_p3 }
 0x3e1   :  { %1341 = shalt.err (!%p1338_p5)
}
 0x3e2   :  { %965 = dma.vmem_to_hbm [thread:$0]  %s960_s10, 256, %s1540_s9, [#allocation4], %s1351_s19, %s1351_s19, %s1352_s20  }
 0x3e3   :  { %1348 = dma.done.wait [#allocation4], 256  }
 0x3e4   :  { %1349 = vsyncadd [#allocation4], 4294967040 }
 0x3e5   :  { %969 = vsyncpa [#allocation3], 1 }
 0x3e6   :  { %970 = vsyncpa [#allocation6], 1 }
 0x3e7   :  { %971 = vsyncpa [#allocation9], 1 }
 0x3e8   :  { %972 = vsyncpa [#allocation4], 1 }

</bundles_post_ra>
